<compile_context>
chip_gen: v7x
topology: tpu7x:2x2x1
jax: 0.10.0
libtpu: 0.0.40
codegen_flags: <defaults>
</compile_context>

<pallas_src>
import math

import jax
import jax.numpy as jnp
from jax.experimental import pallas as pl
from jax.experimental.pallas import tpu as pltpu


def _pe_kernel(x_ref, m_ref, pe_ref, o_ref):
    # x_ref : (TS, D)  one batch element, one sequence tile
    # m_ref : (TS, 1)  float mask tile (0.0 / 1.0)
    # pe_ref: (TS, D)  positional-encoding tile (shared across batch)
    # o_ref : (TS, D)
    keep = m_ref[...] != 0                       # (TS, 1) bool, broadcast over D
    summed = x_ref[...] + pe_ref[...]            # single VPU add
    o_ref[...] = jnp.where(keep, summed, jnp.zeros_like(summed))


def _pick_seq_tile(S, D, itemsize, vmem_budget_bytes=32 * 1024 * 1024, max_rows=1024):
    """Largest multiple-of-8 divisor of S that keeps the double-buffered
    x/pe/out working set (~6 * TS * D * itemsize) under the VMEM budget."""
    cap = max(8, vmem_budget_bytes // (6 * D * itemsize))
    target = int(min(max_rows, cap, S))
    start = target - (target % 8)
    for ts in range(start, 0, -8):
        if S % ts == 0:
            return ts
    return S  # fall back to full-S block (always a legal block shape)


def make_positional_encoding_table(d_model, max_len=4000, dtype=jnp.float32):
    """Deterministic parameter construction, identical to the PyTorch __init__."""
    position = jnp.arange(0, max_len, dtype=jnp.float32)[:, None]            # (max_len, 1)
    div_term = jnp.exp(
        jnp.arange(0, d_model, 2, dtype=jnp.float32) * (-math.log(10000.0) / d_model)
    )                                                                         # (ceil(D/2),)
    angles = position * div_term                                              # (max_len, ceil(D/2))
    pe = jnp.zeros((max_len, d_model), dtype=jnp.float32)
    pe = pe.at[:, 0::2].set(jnp.sin(angles))
    pe = pe.at[:, 1::2].set(jnp.cos(angles)[:, : d_model // 2])
    return pe.astype(dtype)                                                   # (max_len, D)


def positional_encoding_forward(x, mask, pe_table, *, seq_tile=None):
    """x: (B, S, D) float; mask: (B, S, 1) bool; pe_table: (max_len, D)."""
    B, S, D = x.shape
    pe_slice = pe_table[:S, :].astype(x.dtype)        # match x dtype -> half the pe traffic for bf16
    m = mask.astype(x.dtype)                          # bool -> {0,1}, tiny glue op

    itemsize = jnp.dtype(x.dtype).itemsize
    ts = seq_tile if seq_tile is not None else _pick_seq_tile(S, D, itemsize)
    num_s = S // ts

    # batch axis innermost (varies fastest) so the pe block index is constant
    # across consecutive iterations and its DMA is skipped.
    grid = (num_s, B)

    out = pl.pallas_call(
        _pe_kernel,
        out_shape=jax.ShapeDtypeStruct((B, S, D), x.dtype),
        grid_spec=pltpu.PrefetchScalarGridSpec(
            num_scalar_prefetch=0,
            grid=grid,
            in_specs=[
                pl.BlockSpec((None, ts, D), lambda s, b: (b, s, 0)),   # x
                pl.BlockSpec((None, ts, 1), lambda s, b: (b, s, 0)),   # mask
                pl.BlockSpec((ts, D), lambda s, b: (s, 0)),            # pe (shared over b)
            ],
            out_specs=pl.BlockSpec((None, ts, D), lambda s, b: (b, s, 0)),
        ),
        compiler_params=pltpu.CompilerParams(
            dimension_semantics=("parallel", "parallel"),
            vmem_limit_bytes=48 * 1024 * 1024,
        ),
    )(x, m, pe_slice)
    return out


def _reference(x, mask, pe_table):
    """Pure-JAX reference mirroring the PyTorch forward exactly."""
    S = x.shape[1]
    m = mask.astype(x.dtype)
    xm = jnp.where(mask, x, 0)                      # masked_fill(~mask, 0)
    xm = xm + pe_table[None, :S, :].astype(x.dtype)
    return xm * m


if __name__ == "__main__":
    B, S, D = 2, 8, 32
    max_len = 64

    key = jax.random.PRNGKey(0)
    kx, km = jax.random.split(key)
    x = jax.random.normal(kx, (B, S, D), dtype=jnp.float32)
    mask = jax.random.bernoulli(km, p=0.7, shape=(B, S, 1))   # bool (B, S, 1)

    pe_table = make_positional_encoding_table(D, max_len=max_len)

    out = positional_encoding_forward(x, mask, pe_table)
    out = jax.block_until_ready(out)

    ref = _reference(x, mask, pe_table)
    assert out.shape == (B, S, D)
    assert jnp.allclose(out, ref, atol=1e-6, rtol=1e-6), "mismatch vs reference"

    print("KERNEL_OK")
</pallas_src>

<mosaic_0001>
module attributes {stable_mosaic.version = 11 : i64} {
  func.func @_pe_kernel(%arg0: i32, %arg1: i32, %arg2: memref<1x8x32xf32, #tpu.memory_space<vmem>>, %arg3: memref<1x8x1xf32, #tpu.memory_space<vmem>>, %arg4: memref<8x32xf32, #tpu.memory_space<vmem>>, %arg5: memref<1x8x32xf32, #tpu.memory_space<vmem>>) attributes {dimension_semantics = [#tpu.dimension_semantics<parallel>, #tpu.dimension_semantics<parallel>], iteration_bounds = array<i64: 1, 2>, scalar_prefetch = 0 : i64, scratch_operands = 0 : i64, tpu.core_type = #tpu.core_type<tc>, window_params = [{transform_indices = @transform_0, window_bounds = array<i64: 1, 8, 32>}, {transform_indices = @transform_1, window_bounds = array<i64: 1, 8, 1>}, {transform_indices = @transform_2, window_bounds = array<i64: 8, 32>}, {transform_indices = @transform_3, window_bounds = array<i64: 1, 8, 32>}]} {
    %c0 = arith.constant 0 : index
    %c0_0 = arith.constant 0 : index
    %c0_1 = arith.constant 0 : index
    %0 = vector.load %arg3[%c0, %c0_0, %c0_1] : memref<1x8x1xf32, #tpu.memory_space<vmem>>, vector<1x8x1xf32>
    %1 = vector.shape_cast %0 : vector<1x8x1xf32> to vector<8x1xf32>
    %cst = arith.constant 0.000000e+00 : f32
    %2 = vector.broadcast %cst : f32 to vector<8x1xf32>
    %3 = arith.cmpf one, %1, %2 : vector<8x1xf32>
    %c0_2 = arith.constant 0 : index
    %c0_3 = arith.constant 0 : index
    %c0_4 = arith.constant 0 : index
    %4 = vector.load %arg2[%c0_2, %c0_3, %c0_4] : memref<1x8x32xf32, #tpu.memory_space<vmem>>, vector<1x8x32xf32>
    %5 = vector.shape_cast %4 : vector<1x8x32xf32> to vector<8x32xf32>
    %c0_5 = arith.constant 0 : index
    %c0_6 = arith.constant 0 : index
    %6 = vector.load %arg4[%c0_5, %c0_6] : memref<8x32xf32, #tpu.memory_space<vmem>>, vector<8x32xf32>
    %7 = arith.addf %5, %6 : vector<8x32xf32>
    %cst_7 = arith.constant 0.000000e+00 : f32
    %8 = vector.broadcast %cst_7 : f32 to vector<8x32xf32>
    %9 = vector.shape_cast %3 : vector<8x1xi1> to vector<8x1xi1>
    %10 = vector.broadcast %9 : vector<8x1xi1> to vector<8x32xi1>
    %11 = arith.select %10, %7, %8 : vector<8x32xi1>, vector<8x32xf32>
    %c0_8 = arith.constant 0 : index
    %c0_9 = arith.constant 0 : index
    %c0_10 = arith.constant 0 : index
    %12 = vector.load %arg5[%c0_8, %c0_9, %c0_10] : memref<1x8x32xf32, #tpu.memory_space<vmem>>, vector<1x8x32xf32>
    %13 = vector.shape_cast %12 : vector<1x8x32xf32> to vector<8x32xf32>
    %14 = vector.shape_cast %11 : vector<8x32xf32> to vector<1x8x32xf32>
    tpu.vector_store %arg5[%c0_8, %c0_9, %c0_10], %14 {strides = array<i32>} : memref<1x8x32xf32, #tpu.memory_space<vmem>>, vector<1x8x32xf32>,
    return
  }
  func.func @transform_0(%arg0: i32, %arg1: i32) -> (i32, i32, i32) {
    %c0_i32 = arith.constant 0 : i32
    %c0_i32_0 = arith.constant 0 : i32
    return %arg1, %arg0, %c0_i32 : i32, i32, i32
  }
  func.func @transform_1(%arg0: i32, %arg1: i32) -> (i32, i32, i32) {
    %c0_i32 = arith.constant 0 : i32
    %c0_i32_0 = arith.constant 0 : i32
    return %arg1, %arg0, %c0_i32 : i32, i32, i32
  }
  func.func @transform_2(%arg0: i32, %arg1: i32) -> (i32, i32) {
    %c0_i32 = arith.constant 0 : i32
    %c0_i32_0 = arith.constant 0 : i32
    return %arg0, %c0_i32 : i32, i32
  }
  func.func @transform_3(%arg0: i32, %arg1: i32) -> (i32, i32, i32) {
    %c0_i32 = arith.constant 0 : i32
    %c0_i32_0 = arith.constant 0 : i32
    return %arg1, %arg0, %c0_i32 : i32, i32, i32
  }
}

</mosaic_0001>

<bundles_post_ra>
// kernel: tpu_custom_call.1
= control target key start
LH: loop header
LB: loop body
LE: loop exit
PB: predicated region body
PF: predicated region fallthrough
CT: control target
= control target key end

     0   :  { %8 = vsyncpa [#allocation3], 0  ;;  %s655_s0 = inlined_call_operand.vmem [shape: f32[2,8,32], index: 0, kind: input, shape index: {}]   ;;  %s656_s1 = inlined_call_operand.vmem [shape: f32[2,8,1], index: 1, kind: input, shape index: {}]   ;;  %s657_s2 = inlined_call_operand.vmem [shape: f32[8,32], index: 2, kind: input, shape index: {}]   ;;  %s658_s3 = inlined_call_operand.hbm [shape: f32[2,8,32], index: 3, kind: output, shape index: {}]  }
   0x1   :  { %10 = vsyncpa [#allocation3 + $0x1], 0  ;;  %s537_s12 = smov 0   ;;  %s539_s13 = smov 0  }
   0x2   :  { %s541_s14 = smov 0   ;;  %s543_s15 = smov 0  }
   0x3   :  { %s545_s16 = smov 0   ;;  %s547_s17 = smov 0  }
   0x4 LB: > { %s365_s18 = sadd.s32 4294967295, %s513_s17   ;;  %s366_s19 = sadd.s32 4294967294, %s513_s17   ;;  %s513_s17 = sphi %s547_s17, %s16_s17   ;;  %s509_s16 = sphi %s545_s16, %s665_s16   ;;  %s505_s15 = sphi %s543_s15, %s664_s15   ;;  %s501_s14 = sphi %s541_s14, %s663_s14   ;;  %s497_s13 = sphi %s539_s13, %s662_s13   ;;  %s493_s12 = sphi %s537_s12, %s661_s12  }
   0x5   : > { %s25_s20 = sadd.s32 1, %s509_s16  ;;  %s119_s21 = sadd.s32 1, %s501_s14 }
   0x6   : > { %p26_p0 = scmp.ge.s32.totalorder %s25_s20, 2  ;;  %p129_p1 = scmp.ne.s32.totalorder %s501_s14, %s497_s13 }
   0x7   : > { %p130_p2 = scmp.eq.s32.totalorder %s365_s18, 1  ;;  %p135_p3 = scmp.ne.s32.totalorder %s497_s13, %s493_s12 }
   0x8   : > { %s667_s20 = smov (%p26_p0, %s25_s20), 0  ;;  %p136_p5 = scmp.eq.s32.totalorder %s366_s19, 1 }
   0x9   : > { %p577_p4 = por %p130_p2, %p129_p1  ;;  %s114_s23 = ssub.s32 %s509_s16, %s667_s20 }
   0xa   : > { %p370_p6 = scmp.ge.s32.totalorder %s513_s17, 1  ;;  %p117_p7 = scmp.eq.s32.totalorder %s114_s23, 0 }
   0xb   : > { %p584_p8 = por %p136_p5, %p135_p3  ;;  %p181_p9 = scmp.lt.s32.totalorder %s513_s17, 3 }
   0xc   : > { %s590_s25 = scalar_select %p117_p7, %s501_s14, %s119_s21  }
   0xd   : > { %p182_p10 = pnand %p370_p6, %p181_p9 }
   0xe   : > { %p218_p11 = scmp.lt.s32.totalorder (!%p182_p10), %s505_s15, 1  ;;  %v515_v0 = vmov (!%p182_p10), 0   ;;  %s215_s4 = sand.u32 (!%p182_p10), 1, %s497_s13   ;;  %v239_v3 = vld [vmem:[%s657_s2] sm:$0xff] (!%p182_p10)  ;;  %vm247_vm1 = vcmask (!%p182_p10), 261120  }
   0xf   : > { %185 = sbr.rel (%p182_p10) target bundleno = 173 (0xad), region = 32  ;;  %434 = vset.pattern.permute.xlu0 (!%p182_p10), %v515_v0  ;;  %s371_s5 = sshll.u32 (!%p182_p10), %s215_s4, 3 }
  0x10   : > { %s375_s11 = sshll.u32 (!%p182_p10), %s505_s15, 7  ;;  %s217_s18 = scalar_lea.vmem (!%p182_p10), [#allocation2], %s371_s5 }
  0x11   : > { %s264_s19 = sshll.u32 (!%p182_p10), %s217_s18, 4  ;;  %s610_s19 = int_to_ptr.vmem [resolvable:$true] %s264_s19 }
  0x12   : > { %s435_s28 = scalar_lea.vmem (!%p182_p10), %s610_s19, 128 }
  0x13   : > { %p436_p12 = scmp.ne.s32.totalorder (!%p182_p10), %s610_s19, %s435_s28 }
  0x15   : > { %p437_p13 = pnand (!%p182_p10), %p436_p12, %p577_p4 }
  0x16   : > { %s219_s26 = scalar_select %p218_p11, %s505_s15, 1 }
  0x17   : > { %p438_p0 = pneg %p437_p13  ;;  %s516_s15 = smov [#allocation2]  }
  0x18   : > { %s372_s27 = sshll.u32 %s219_s26, 3  ;;  %s608_s26 = scalar_lea.hbm %s658_s3, %s375_s11 }
  0x19   : > { %s231_s30 = scalar_lea.vmem %s656_s1, %s372_s27  ;;  %s224_s8 = scalar_lea.vmem %s655_s0, %s372_s27 }
  0x1a   : > { %v236_v1 = vld [vmem:[%s231_s30] sm:$0xff]  ;;  %s250_s27 = scalar_lea.sflag [#allocation3], %s215_s4  ;;  %s439_s29 = sshll.u32 %s516_s15, 4  ;;  %s440_s29 = int_to_ptr.vmem [resolvable:$false] %s439_s29 }
  0x1b   : > { %vm237_vm0 = vcmp.ne.f32.partialorder %v236_v1, 0.0  ;;  %v238_v4 = vld [vmem:[%s224_s8] sm:$0xff]  ;;  %s441_s30 = scalar_lea.vmem %s440_s29, 256  ;;  %p442_p1 = scmp.lt.s32.totalorder %s610_s19, %s440_s29 }
  0x1c   : > { %v241_v2 = vsel %vm237_vm0, 1, %v515_v0  ;;  %v240_v5 = vadd.f32 %v239_v3, %v238_v4  ;;  %p443_p2 = scmp.lt.s32.totalorder %s441_s30, %s435_s28 }
  0x1d   : > { %243 = vperm.xlu0 %434, %v241_v2  }
  0x1e   : > { %p444_p3 = por %p443_p2, %p442_p1 }
  0x20   : > { %p445_p5 = pnand %p444_p3, %p438_p0 }
  0x9c   : > { %v244_v6 = vpop.permute.xlu0 %243 }
  0x9d   : > { %vm245_vm2 = vcmp.eq.s32.totalorder %v244_v6, 1 }
  0x9e   : > { %v246_v7 = vsel %vm245_vm2, %v240_v5, 0.0 }
  0x9f   : > { %248 = vst.msk [vmem:[%s217_s18] sm:$0xff] %vm247_vm1, %v246_v7 }
  0xa0   : > { %448 = shalt.err (!%p445_p5)
}
  0xa1   : > { %s449_s4 = scalar_lea.hbm %s608_s26, 128  ;;  %s453_s7 = scalar_lea.hbm %s658_s3, 256 }
  0xa2   : > { %p450_p6 = scmp.ne.s32.totalorder %s608_s26, %s449_s4  ;;  %p454_p10 = scmp.lt.u32.totalorder %s608_s26, %s658_s3 }
  0xa3   : > { %p455_p11 = scmp.lt.u32.totalorder %s453_s7, %s449_s4  ;;  %p457_p13 = scmp.lt.u32.totalorder %s449_s4, %s608_s26 }
  0xa4   : > { %p451_p7 = pnand %p450_p6, %p577_p4 }
  0xa5   : > { %p456_p12 = por %p455_p11, %p454_p10 }
  0xa6   : > { %p452_p9 = pneg %p451_p7 }
  0xa7   : > { %p458_p0 = por %p457_p13, %p456_p12 }
  0xa9   : > { %p459_p1 = pnand %p458_p0, %p452_p9 }
  0xab   : > { %462 = shalt.err (!%p459_p1)
}
  0xac   : > { %378 = dma.vmem_to_hbm [thread:$0]  (%p577_p4), %s610_s19, 128, %s608_s26, %s250_s27  }
  0xad PF: > { %p384_p2 = scmp.ge.s32.totalorder %s513_s17, 2  ;;  %s276_s10 = sand.u32 1, %s493_s12  }
  0xae   : > { %s277_s11 = scalar_lea.sflag [#allocation3], %s276_s10 }
  0xaf   : > { %p381_p3 = pnand %p384_p2, %p584_p8 }
  0xb1   : > { %488 = dma.done.wait (!%p381_p3), %s277_s11, 128  }
  0xb2   : > { %490 = vsyncadd (!%p381_p3), %s277_s11, 4294967168  ;;  %s16_s17 = sadd.s32 1, %s513_s17   ;;  %s661_s12 = smov %s497_s13 }
  0xb3   : > { %p13_p5 = scmp.ge.s32.totalorder %s16_s17, 4   ;;  %s662_s13 = smov %s501_s14 }
  0xb4   : > { %s663_s14 = smov %s590_s25  ;;  %s664_s15 = smov %s509_s16 }
  0xb5   : > { %s665_s16 = smov %s667_s20  ;;  %15 = sbr.rel (!%p13_p5) target bundleno = 4 (0x4), region = 73 }
  0xbc   :  { %282 = vsyncpa [#allocation3], 1 }
  0xbd   :  { %284 = vsyncpa [#allocation3 + $0x1], 1 }

</bundles_post_ra>
